<compile_context>
chip_gen: v5e
topology: v5e:2x2
jax: 0.10.0
libtpu: 0.0.40
codegen_flags: <defaults>
</compile_context>

<pallas_src>
import functools

import jax
import jax.numpy as jnp
from jax import lax
from jax.experimental import pallas as pl
from jax.experimental.pallas import tpu as pltpu

EPS = 1e-5


def encoder_kernel(x_ref, gamma_ref, beta_ref, wxf_ref, wxb_ref, wh_ref, b_ref,
                   y_ref, hc_ref, *, T, B):
    # x_ref  : (B*T, D) batch-major rows (row b*T + t = x[b, t])
    # wxf/wxb: (D, 8H)  input->gates for fwd / bwd direction (other-direction
    #                   columns zero so the two halves add independently)
    # wh_ref : (2H, 8H) block-diagonal recurrent weights (both directions)
    # b_ref  : (1, 8H)  combined biases (bih+bhh) for both directions
    # y_ref  : (B, T, 2H) output in the caller's layout
    # hc_ref : (2, B, 2H) final [h; c], columns [0:H] fwd / [H:2H] bwd
    H = wh_ref.shape[0] // 2
    TWO_H = 2 * H
    G = 8 * H

    # ---- LayerNorm over the feature axis --------------------------------
    x = x_ref[...].astype(jnp.float32)                         # (B*T, D)
    mean = jnp.mean(x, axis=-1, keepdims=True)
    var = jnp.mean((x - mean) ** 2, axis=-1, keepdims=True)
    xn = (x - mean) * lax.rsqrt(var + EPS)
    xn = xn * gamma_ref[...] + beta_ref[...]                   # (B*T, D)

    # ---- Hoisted input projections (off the serial chain) ---------------
    # Gate layout inside 8H: [i_f i_b | f_f f_b | g_f g_b | o_f o_b].
    gxf = (jnp.dot(xn, wxf_ref[...], preferred_element_type=jnp.float32)
           + b_ref[...]).reshape(B, T, G)                      # (B, T, 8H)
    gxb = jnp.dot(xn, wxb_ref[...],
                  preferred_element_type=jnp.float32).reshape(B, T, G)

    # Pre-combine forward step s with backward step T-1-s: data-independent
    # of the recurrence, so it is hoisted out of the dependent chain.
    gxc = [gxf[:, s, :] + gxb[:, T - 1 - s, :] for s in range(T)]  # (B, 8H) each

    wh = wh_ref[...]                                            # (2H, 8H)

    # Combined hidden / cell state: columns [0:H] forward, [H:2H] backward.
    h = jnp.zeros((B, TWO_H), jnp.float32)
    c = jnp.zeros((B, TWO_H), jnp.float32)

    fwd_out = [None] * T
    bwd_out = [None] * T

    for s in range(T):                 # fully unrolled: T is static & small
        z = jnp.dot(h, wh, preferred_element_type=jnp.float32) + gxc[s]  # (B, 8H)
        sz = jax.nn.sigmoid(z)         # one EUP push covers i, f, o columns
        tz = jnp.tanh(z)               # one EUP push covers g columns
        i = sz[:, 0 * TWO_H:1 * TWO_H]
        f = sz[:, 1 * TWO_H:2 * TWO_H]
        g = tz[:, 2 * TWO_H:3 * TWO_H]
        o = sz[:, 3 * TWO_H:4 * TWO_H]
        c = f * c + i * g
        h = o * jnp.tanh(c)
        fwd_out[s] = h[:, 0:H]                 # forward output at time t = s
        bwd_out[T - 1 - s] = h[:, H:TWO_H]     # backward output at time t = T-1-s

    # ---- Single dense stores after the recurrence ------------------------
    yf = jnp.stack(fwd_out, axis=1)            # (B, T, H)
    yb = jnp.stack(bwd_out, axis=1)            # (B, T, H)
    y_ref[...] = jnp.concatenate([yf, yb], axis=-1)            # (B, T, 2H)
    hc_ref[...] = jnp.stack([h, c], axis=0)                    # (2, B, 2H)


def encoder_forward(x, packed):
    """x: (B, T, D) float32 (batch_first).  Returns (y, (h_n, c_n)) like PyTorch."""
    B, T, D = x.shape
    H = D
    x2d = x.reshape(B * T, D)          # batch-major: free reshape, no transpose

    vmem = pl.BlockSpec(memory_space=pltpu.MemorySpace.VMEM)
    kernel = functools.partial(encoder_kernel, T=T, B=B)
    # Whole problem is a few KB -> grid-free, everything resident in VMEM.
    y, hc = pl.pallas_call(
        kernel,
        out_shape=(jax.ShapeDtypeStruct((B, T, 2 * H), jnp.float32),
                   jax.ShapeDtypeStruct((2, B, 2 * H), jnp.float32)),
        in_specs=[vmem] * 7,
        out_specs=(vmem, vmem),
    )(x2d, packed["gamma"], packed["beta"],
      packed["wxf"], packed["wxb"], packed["wh"], packed["b"])

    hf, cf = hc[0], hc[1]                                      # (B, 2H) each
    hn = jnp.stack([hf[:, :H], hf[:, H:]], axis=0)             # (2, B, H)
    cn = jnp.stack([cf[:, :H], cf[:, H:]], axis=0)             # (2, B, H)
    return y, (hn, cn)


def init_params(key, D=13):
    """Deterministic synthetic params with PyTorch LSTM/LayerNorm shapes."""
    H = D
    k = jax.random.split(key, 10)
    s = 1.0 / jnp.sqrt(jnp.float32(H))

    def u(kk, shape):
        return jax.random.uniform(kk, shape, jnp.float32, -s, s)

    # PyTorch gate order (i, f, g, o); weight_ih: (4H, D) stored as (4, H, D).
    return dict(
        wih_f=u(k[0], (4, H, D)), whh_f=u(k[1], (4, H, H)),
        bih_f=u(k[2], (4, H)),    bhh_f=u(k[3], (4, H)),
        wih_b=u(k[4], (4, H, D)), whh_b=u(k[5], (4, H, H)),
        bih_b=u(k[6], (4, H)),    bhh_b=u(k[7], (4, H)),
        gamma=1.0 + 0.1 * jax.random.normal(k[8], (D,), jnp.float32),
        beta=0.1 * jax.random.normal(k[9], (D,), jnp.float32),
    )


def pack_params(p):
    """Pack raw PyTorch-shaped params into the lane-packed kernel layout."""
    H, D = p["wih_f"].shape[1], p["wih_f"].shape[2]
    zHH = jnp.zeros((H, H), jnp.float32)
    zDH = jnp.zeros((D, H), jnp.float32)

    wh_blocks, wxf_blocks, wxb_blocks, b_blocks = [], [], [], []
    for gate in range(4):  # i, f, g, o
        # Recurrent block-diagonal (2H, 2H) per gate: h_f->gate_f, h_b->gate_b.
        top = jnp.concatenate([p["whh_f"][gate].T, zHH], axis=1)
        bot = jnp.concatenate([zHH, p["whh_b"][gate].T], axis=1)
        wh_blocks.append(jnp.concatenate([top, bot], axis=0))
        # Split per-direction input projections (D, 2H) per gate, zero-padded
        # in the other direction's columns so fwd/bwd halves add independently.
        wxf_blocks.append(jnp.concatenate([p["wih_f"][gate].T, zDH], axis=1))
        wxb_blocks.append(jnp.concatenate([zDH, p["wih_b"][gate].T], axis=1))
        b_blocks.append(jnp.concatenate([p["bih_f"][gate] + p["bhh_f"][gate],
                                         p["bih_b"][gate] + p["bhh_b"][gate]]))

    return dict(
        gamma=p["gamma"].reshape(1, D), beta=p["beta"].reshape(1, D),
        wxf=jnp.concatenate(wxf_blocks, axis=1),               # (D, 8H)
        wxb=jnp.concatenate(wxb_blocks, axis=1),               # (D, 8H)
        wh=jnp.concatenate(wh_blocks, axis=1),                 # (2H, 8H)
        b=jnp.concatenate(b_blocks).reshape(1, 8 * H),         # (1, 8H)
    )


def encoder_ref(x, p):
    """Pure-JAX reference (same math as torch LayerNorm + bidirectional LSTM)."""
    B, T, D = x.shape
    H = D
    mean = jnp.mean(x, -1, keepdims=True)
    var = jnp.mean((x - mean) ** 2, -1, keepdims=True)
    xn = (x - mean) / jnp.sqrt(var + EPS) * p["gamma"] + p["beta"]

    def run(wih, whh, bih, bhh, reverse):
        def step(carry, x_t):
            h, c = carry
            i = jax.nn.sigmoid(x_t @ wih[0].T + h @ whh[0].T + bih[0] + bhh[0])
            f = jax.nn.sigmoid(x_t @ wih[1].T + h @ whh[1].T + bih[1] + bhh[1])
            g = jnp.tanh(x_t @ wih[2].T + h @ whh[2].T + bih[2] + bhh[2])
            o = jax.nn.sigmoid(x_t @ wih[3].T + h @ whh[3].T + bih[3] + bhh[3])
            c = f * c + i * g
            h = o * jnp.tanh(c)
            return (h, c), h

        xs = jnp.transpose(xn, (1, 0, 2))
        (h, c), ys = lax.scan(step, (jnp.zeros((B, H)), jnp.zeros((B, H))), xs,
                              reverse=reverse)
        return jnp.transpose(ys, (1, 0, 2)), h, c

    yf, hf, cf = run(p["wih_f"], p["whh_f"], p["bih_f"], p["bhh_f"], False)
    yb, hb, cb = run(p["wih_b"], p["whh_b"], p["bih_b"], p["bhh_b"], True)
    y = jnp.concatenate([yf, yb], axis=-1)
    return y, (jnp.stack([hf, hb]), jnp.stack([cf, cb]))


if __name__ == "__main__":
    key = jax.random.PRNGKey(0)
    kx, kp = jax.random.split(key)
    B, T, D = 2, 8, 13                         # input_size=13 per module default
    x = jax.random.normal(kx, (B, T, D), jnp.float32)
    raw = init_params(kp, D)
    packed = pack_params(raw)

    y, (hn, cn) = encoder_forward(x, packed)
    jax.block_until_ready((y, hn, cn))

    y_r, (hn_r, cn_r) = encoder_ref(x, raw)
    assert y.shape == (B, T, 2 * D) and hn.shape == (2, B, D) and cn.shape == (2, B, D)
    assert jnp.allclose(y, y_r, atol=2e-3, rtol=2e-3)
    assert jnp.allclose(hn, hn_r, atol=2e-3, rtol=2e-3)
    assert jnp.allclose(cn, cn_r, atol=2e-3, rtol=2e-3)
    print("KERNEL_OK")
</pallas_src>

<mosaic_0001>
module attributes {stable_mosaic.version = 11 : i64} {
  func.func @encoder_kernel(%arg0: memref<16x13xf32, #tpu.memory_space<vmem>>, %arg1: memref<1x13xf32, #tpu.memory_space<vmem>>, %arg2: memref<1x13xf32, #tpu.memory_space<vmem>>, %arg3: memref<13x104xf32, #tpu.memory_space<vmem>>, %arg4: memref<13x104xf32, #tpu.memory_space<vmem>>, %arg5: memref<26x104xf32, #tpu.memory_space<vmem>>, %arg6: memref<1x104xf32, #tpu.memory_space<vmem>>, %arg7: memref<2x8x26xf32, #tpu.memory_space<vmem>>, %arg8: memref<2x2x26xf32, #tpu.memory_space<vmem>>) attributes {dimension_semantics = [], scalar_prefetch = 0 : i64, scratch_operands = 0 : i64, tpu.core_type = #tpu.core_type<tc>} {
    %c0 = arith.constant 0 : index
    %c0_0 = arith.constant 0 : index
    %0 = vector.load %arg0[%c0, %c0_0] : memref<16x13xf32, #tpu.memory_space<vmem>>, vector<16x13xf32>
    %cst = arith.constant dense<0.000000e+00> : vector<16xf32>
    %1 = vector.multi_reduction <add>, %0, %cst [1] : vector<16x13xf32> to vector<16xf32>
    %2 = vector.shape_cast %1 : vector<16xf32> to vector<16x1xf32>
    %cst_1 = arith.constant 1.300000e+01 : f32
    %3 = vector.broadcast %cst_1 : f32 to vector<16x1xf32>
    %4 = arith.divf %2, %3 : vector<16x1xf32>
    %5 = vector.broadcast %4 : vector<16x1xf32> to vector<16x13xf32>
    %6 = arith.subf %0, %5 : vector<16x13xf32>
    %7 = arith.mulf %6, %6 : vector<16x13xf32>
    %cst_2 = arith.constant dense<0.000000e+00> : vector<16xf32>
    %8 = vector.multi_reduction <add>, %7, %cst_2 [1] : vector<16x13xf32> to vector<16xf32>
    %9 = vector.shape_cast %8 : vector<16xf32> to vector<16x1xf32>
    %cst_3 = arith.constant 1.300000e+01 : f32
    %10 = vector.broadcast %cst_3 : f32 to vector<16x1xf32>
    %11 = arith.divf %9, %10 : vector<16x1xf32>
    %12 = vector.broadcast %4 : vector<16x1xf32> to vector<16x13xf32>
    %13 = arith.subf %0, %12 : vector<16x13xf32>
    %cst_4 = arith.constant 9.99999974E-6 : f32
    %14 = vector.broadcast %cst_4 : f32 to vector<16x1xf32>
    %15 = arith.addf %11, %14 : vector<16x1xf32>
    %16 = math.rsqrt %15 : vector<16x1xf32>
    %17 = vector.broadcast %16 : vector<16x1xf32> to vector<16x13xf32>
    %18 = arith.mulf %13, %17 : vector<16x13xf32>
    %c0_5 = arith.constant 0 : index
    %c0_6 = arith.constant 0 : index
    %19 = vector.load %arg1[%c0_5, %c0_6] : memref<1x13xf32, #tpu.memory_space<vmem>>, vector<1x13xf32>
    %20 = vector.broadcast %19 : vector<1x13xf32> to vector<16x13xf32>
    %21 = arith.mulf %18, %20 : vector<16x13xf32>
    %c0_7 = arith.constant 0 : index
    %c0_8 = arith.constant 0 : index
    %22 = vector.load %arg2[%c0_7, %c0_8] : memref<1x13xf32, #tpu.memory_space<vmem>>, vector<1x13xf32>
    %23 = vector.broadcast %22 : vector<1x13xf32> to vector<16x13xf32>
    %24 = arith.addf %21, %23 : vector<16x13xf32>
    %c0_9 = arith.constant 0 : index
    %c0_10 = arith.constant 0 : index
    %25 = vector.load %arg3[%c0_9, %c0_10] : memref<13x104xf32, #tpu.memory_space<vmem>>, vector<13x104xf32>
    %cst_11 = arith.constant dense<0.000000e+00> : vector<16x104xf32>
    %26 = tpu.matmul %24, %25, %cst_11 {dimension_numbers = #tpu.dot_dimension_numbers<[1], [0], [0], [1], [0, 0, 1, 1], [], []>} : vector<16x13xf32>, vector<13x104xf32>, vector<16x104xf32> -> vector<16x104xf32>
    %c0_12 = arith.constant 0 : index
    %c0_13 = arith.constant 0 : index
    %27 = vector.load %arg6[%c0_12, %c0_13] : memref<1x104xf32, #tpu.memory_space<vmem>>, vector<1x104xf32>
    %28 = vector.broadcast %27 : vector<1x104xf32> to vector<16x104xf32>
    %29 = arith.addf %26, %28 : vector<16x104xf32>
    %30 = vector.shape_cast %29 : vector<16x104xf32> to vector<2x8x104xf32>
    %c0_14 = arith.constant 0 : index
    %c0_15 = arith.constant 0 : index
    %31 = vector.load %arg4[%c0_14, %c0_15] : memref<13x104xf32, #tpu.memory_space<vmem>>, vector<13x104xf32>
    %cst_16 = arith.constant dense<0.000000e+00> : vector<16x104xf32>
    %32 = tpu.matmul %24, %31, %cst_16 {dimension_numbers = #tpu.dot_dimension_numbers<[1], [0], [0], [1], [0, 0, 1, 1], [], []>} : vector<16x13xf32>, vector<13x104xf32>, vector<16x104xf32> -> vector<16x104xf32>
    %33 = vector.shape_cast %32 : vector<16x104xf32> to vector<2x8x104xf32>
    %34 = vector.extract_strided_slice %30 {offsets = [0, 0, 0], sizes = [2, 1, 104], strides = [1, 1, 1]} : vector<2x8x104xf32> to vector<2x1x104xf32>
    %35 = vector.shape_cast %34 : vector<2x1x104xf32> to vector<2x104xf32>
    %36 = vector.extract_strided_slice %33 {offsets = [0, 7, 0], sizes = [2, 1, 104], strides = [1, 1, 1]} : vector<2x8x104xf32> to vector<2x1x104xf32>
    %37 = vector.shape_cast %36 : vector<2x1x104xf32> to vector<2x104xf32>
    %38 = arith.addf %35, %37 : vector<2x104xf32>
    %39 = vector.extract_strided_slice %30 {offsets = [0, 1, 0], sizes = [2, 1, 104], strides = [1, 1, 1]} : vector<2x8x104xf32> to vector<2x1x104xf32>
    %40 = vector.shape_cast %39 : vector<2x1x104xf32> to vector<2x104xf32>
    %41 = vector.extract_strided_slice %33 {offsets = [0, 6, 0], sizes = [2, 1, 104], strides = [1, 1, 1]} : vector<2x8x104xf32> to vector<2x1x104xf32>
    %42 = vector.shape_cast %41 : vector<2x1x104xf32> to vector<2x104xf32>
    %43 = arith.addf %40, %42 : vector<2x104xf32>
    %44 = vector.extract_strided_slice %30 {offsets = [0, 2, 0], sizes = [2, 1, 104], strides = [1, 1, 1]} : vector<2x8x104xf32> to vector<2x1x104xf32>
    %45 = vector.shape_cast %44 : vector<2x1x104xf32> to vector<2x104xf32>
    %46 = vector.extract_strided_slice %33 {offsets = [0, 5, 0], sizes = [2, 1, 104], strides = [1, 1, 1]} : vector<2x8x104xf32> to vector<2x1x104xf32>
    %47 = vector.shape_cast %46 : vector<2x1x104xf32> to vector<2x104xf32>
    %48 = arith.addf %45, %47 : vector<2x104xf32>
    %49 = vector.extract_strided_slice %30 {offsets = [0, 3, 0], sizes = [2, 1, 104], strides = [1, 1, 1]} : vector<2x8x104xf32> to vector<2x1x104xf32>
    %50 = vector.shape_cast %49 : vector<2x1x104xf32> to vector<2x104xf32>
    %51 = vector.extract_strided_slice %33 {offsets = [0, 4, 0], sizes = [2, 1, 104], strides = [1, 1, 1]} : vector<2x8x104xf32> to vector<2x1x104xf32>
    %52 = vector.shape_cast %51 : vector<2x1x104xf32> to vector<2x104xf32>
    %53 = arith.addf %50, %52 : vector<2x104xf32>
    %54 = vector.extract_strided_slice %30 {offsets = [0, 4, 0], sizes = [2, 1, 104], strides = [1, 1, 1]} : vector<2x8x104xf32> to vector<2x1x104xf32>
    %55 = vector.shape_cast %54 : vector<2x1x104xf32> to vector<2x104xf32>
    %56 = vector.extract_strided_slice %33 {offsets = [0, 3, 0], sizes = [2, 1, 104], strides = [1, 1, 1]} : vector<2x8x104xf32> to vector<2x1x104xf32>
    %57 = vector.shape_cast %56 : vector<2x1x104xf32> to vector<2x104xf32>
    %58 = arith.addf %55, %57 : vector<2x104xf32>
    %59 = vector.extract_strided_slice %30 {offsets = [0, 5, 0], sizes = [2, 1, 104], strides = [1, 1, 1]} : vector<2x8x104xf32> to vector<2x1x104xf32>
    %60 = vector.shape_cast %59 : vector<2x1x104xf32> to vector<2x104xf32>
    %61 = vector.extract_strided_slice %33 {offsets = [0, 2, 0], sizes = [2, 1, 104], strides = [1, 1, 1]} : vector<2x8x104xf32> to vector<2x1x104xf32>
    %62 = vector.shape_cast %61 : vector<2x1x104xf32> to vector<2x104xf32>
    %63 = arith.addf %60, %62 : vector<2x104xf32>
    %64 = vector.extract_strided_slice %30 {offsets = [0, 6, 0], sizes = [2, 1, 104], strides = [1, 1, 1]} : vector<2x8x104xf32> to vector<2x1x104xf32>
    %65 = vector.shape_cast %64 : vector<2x1x104xf32> to vector<2x104xf32>
    %66 = vector.extract_strided_slice %33 {offsets = [0, 1, 0], sizes = [2, 1, 104], strides = [1, 1, 1]} : vector<2x8x104xf32> to vector<2x1x104xf32>
    %67 = vector.shape_cast %66 : vector<2x1x104xf32> to vector<2x104xf32>
    %68 = arith.addf %65, %67 : vector<2x104xf32>
    %69 = vector.extract_strided_slice %30 {offsets = [0, 7, 0], sizes = [2, 1, 104], strides = [1, 1, 1]} : vector<2x8x104xf32> to vector<2x1x104xf32>
    %70 = vector.shape_cast %69 : vector<2x1x104xf32> to vector<2x104xf32>
    %71 = vector.extract_strided_slice %33 {offsets = [0, 0, 0], sizes = [2, 1, 104], strides = [1, 1, 1]} : vector<2x8x104xf32> to vector<2x1x104xf32>
    %72 = vector.shape_cast %71 : vector<2x1x104xf32> to vector<2x104xf32>
    %73 = arith.addf %70, %72 : vector<2x104xf32>
    %c0_17 = arith.constant 0 : index
    %c0_18 = arith.constant 0 : index
    %74 = vector.load %arg5[%c0_17, %c0_18] : memref<26x104xf32, #tpu.memory_space<vmem>>, vector<26x104xf32>
    %cst_19 = arith.constant 0.000000e+00 : f32
    %75 = vector.broadcast %cst_19 : f32 to vector<2x26xf32>
    %cst_20 = arith.constant 0.000000e+00 : f32
    %76 = vector.broadcast %cst_20 : f32 to vector<2x26xf32>
    %cst_21 = arith.constant dense<0.000000e+00> : vector<2x104xf32>
    %77 = tpu.matmul %75, %74, %cst_21 {dimension_numbers = #tpu.dot_dimension_numbers<[1], [0], [0], [1], [0, 0, 1, 1], [], []>} : vector<2x26xf32>, vector<26x104xf32>, vector<2x104xf32> -> vector<2x104xf32>
    %78 = arith.addf %77, %38 : vector<2x104xf32>
    %79 = arith.negf %78 : vector<2x104xf32>
    %80 = math.exp %79 : vector<2x104xf32>
    %cst_22 = arith.constant 1.000000e+00 : f32
    %81 = vector.broadcast %cst_22 : f32 to vector<2x104xf32>
    %82 = arith.addf %81, %80 : vector<2x104xf32>
    %83 = arith.divf %81, %82 : vector<2x104xf32>
    %84 = math.tanh %78 : vector<2x104xf32>
    %85 = vector.extract_strided_slice %83 {offsets = [0, 0], sizes = [2, 26], strides = [1, 1]} : vector<2x104xf32> to vector<2x26xf32>
    %86 = vector.extract_strided_slice %83 {offsets = [0, 26], sizes = [2, 26], strides = [1, 1]} : vector<2x104xf32> to vector<2x26xf32>
    %87 = vector.extract_strided_slice %84 {offsets = [0, 52], sizes = [2, 26], strides = [1, 1]} : vector<2x104xf32> to vector<2x26xf32>
    %88 = vector.extract_strided_slice %83 {offsets = [0, 78], sizes = [2, 26], strides = [1, 1]} : vector<2x104xf32> to vector<2x26xf32>
    %89 = arith.mulf %86, %76 : vector<2x26xf32>
    %90 = arith.mulf %85, %87 : vector<2x26xf32>
    %91 = arith.addf %89, %90 : vector<2x26xf32>
    %92 = math.tanh %91 : vector<2x26xf32>
    %93 = arith.mulf %88, %92 : vector<2x26xf32>
    %94 = vector.extract_strided_slice %93 {offsets = [0, 0], sizes = [2, 13], strides = [1, 1]} : vector<2x26xf32> to vector<2x13xf32>
    %95 = vector.extract_strided_slice %93 {offsets = [0, 13], sizes = [2, 13], strides = [1, 1]} : vector<2x26xf32> to vector<2x13xf32>
    %cst_23 = arith.constant dense<0.000000e+00> : vector<2x104xf32>
    %96 = tpu.matmul %93, %74, %cst_23 {dimension_numbers = #tpu.dot_dimension_numbers<[1], [0], [0], [1], [0, 0, 1, 1], [], []>} : vector<2x26xf32>, vector<26x104xf32>, vector<2x104xf32> -> vector<2x104xf32>
    %97 = arith.addf %96, %43 : vector<2x104xf32>
    %98 = arith.negf %97 : vector<2x104xf32>
    %99 = math.exp %98 : vector<2x104xf32>
    %cst_24 = arith.constant 1.000000e+00 : f32
    %100 = vector.broadcast %cst_24 : f32 to vector<2x104xf32>
    %101 = arith.addf %100, %99 : vector<2x104xf32>
    %102 = arith.divf %100, %101 : vector<2x104xf32>
    %103 = math.tanh %97 : vector<2x104xf32>
    %104 = vector.extract_strided_slice %102 {offsets = [0, 0], sizes = [2, 26], strides = [1, 1]} : vector<2x104xf32> to vector<2x26xf32>
    %105 = vector.extract_strided_slice %102 {offsets = [0, 26], sizes = [2, 26], strides = [1, 1]} : vector<2x104xf32> to vector<2x26xf32>
    %106 = vector.extract_strided_slice %103 {offsets = [0, 52], sizes = [2, 26], strides = [1, 1]} : vector<2x104xf32> to vector<2x26xf32>
    %107 = vector.extract_strided_slice %102 {offsets = [0, 78], sizes = [2, 26], strides = [1, 1]} : vector<2x104xf32> to vector<2x26xf32>
    %108 = arith.mulf %105, %91 : vector<2x26xf32>
    %109 = arith.mulf %104, %106 : vector<2x26xf32>
    %110 = arith.addf %108, %109 : vector<2x26xf32>
    %111 = math.tanh %110 : vector<2x26xf32>
    %112 = arith.mulf %107, %111 : vector<2x26xf32>
    %113 = vector.extract_strided_slice %112 {offsets = [0, 0], sizes = [2, 13], strides = [1, 1]} : vector<2x26xf32> to vector<2x13xf32>
    %114 = vector.extract_strided_slice %112 {offsets = [0, 13], sizes = [2, 13], strides = [1, 1]} : vector<2x26xf32> to vector<2x13xf32>
    %cst_25 = arith.constant dense<0.000000e+00> : vector<2x104xf32>
    %115 = tpu.matmul %112, %74, %cst_25 {dimension_numbers = #tpu.dot_dimension_numbers<[1], [0], [0], [1], [0, 0, 1, 1], [], []>} : vector<2x26xf32>, vector<26x104xf32>, vector<2x104xf32> -> vector<2x104xf32>
    %116 = arith.addf %115, %48 : vector<2x104xf32>
    %117 = arith.negf %116 : vector<2x104xf32>
    %118 = math.exp %117 : vector<2x104xf32>
    %cst_26 = arith.constant 1.000000e+00 : f32
    %119 = vector.broadcast %cst_26 : f32 to vector<2x104xf32>
    %120 = arith.addf %119, %118 : vector<2x104xf32>
    %121 = arith.divf %119, %120 : vector<2x104xf32>
    %122 = math.tanh %116 : vector<2x104xf32>
    %123 = vector.extract_strided_slice %121 {offsets = [0, 0], sizes = [2, 26], strides = [1, 1]} : vector<2x104xf32> to vector<2x26xf32>
    %124 = vector.extract_strided_slice %121 {offsets = [0, 26], sizes = [2, 26], strides = [1, 1]} : vector<2x104xf32> to vector<2x26xf32>
    %125 = vector.extract_strided_slice %122 {offsets = [0, 52], sizes = [2, 26], strides = [1, 1]} : vector<2x104xf32> to vector<2x26xf32>
    %126 = vector.extract_strided_slice %121 {offsets = [0, 78], sizes = [2, 26], strides = [1, 1]} : vector<2x104xf32> to vector<2x26xf32>
    %127 = arith.mulf %124, %110 : vector<2x26xf32>
    %128 = arith.mulf %123, %125 : vector<2x26xf32>
    %129 = arith.addf %127, %128 : vector<2x26xf32>
    %130 = math.tanh %129 : vector<2x26xf32>
    %131 = arith.mulf %126, %130 : vector<2x26xf32>
    %132 = vector.extract_strided_slice %131 {offsets = [0, 0], sizes = [2, 13], strides = [1, 1]} : vector<2x26xf32> to vector<2x13xf32>
    %133 = vector.extract_strided_slice %131 {offsets = [0, 13], sizes = [2, 13], strides = [1, 1]} : vector<2x26xf32> to vector<2x13xf32>
    %cst_27 = arith.constant dense<0.000000e+00> : vector<2x104xf32>
    %134 = tpu.matmul %131, %74, %cst_27 {dimension_numbers = #tpu.dot_dimension_numbers<[1], [0], [0], [1], [0, 0, 1, 1], [], []>} : vector<2x26xf32>, vector<26x104xf32>, vector<2x104xf32> -> vector<2x104xf32>
    %135 = arith.addf %134, %53 : vector<2x104xf32>
    %136 = arith.negf %135 : vector<2x104xf32>
    %137 = math.exp %136 : vector<2x104xf32>
    %cst_28 = arith.constant 1.000000e+00 : f32
    %138 = vector.broadcast %cst_28 : f32 to vector<2x104xf32>
    %139 = arith.addf %138, %137 : vector<2x104xf32>
    %140 = arith.divf %138, %139 : vector<2x104xf32>
    %141 = math.tanh %135 : vector<2x104xf32>
    %142 = vector.extract_strided_slice %140 {offsets = [0, 0], sizes = [2, 26], strides = [1, 1]} : vector<2x104xf32> to vector<2x26xf32>
    %143 = vector.extract_strided_slice %140 {offsets = [0, 26], sizes = [2, 26], strides = [1, 1]} : vector<2x104xf32> to vector<2x26xf32>
    %144 = vector.extract_strided_slice %141 {offsets = [0, 52], sizes = [2, 26], strides = [1, 1]} : vector<2x104xf32> to vector<2x26xf32>
    %145 = vector.extract_strided_slice %140 {offsets = [0, 78], sizes = [2, 26], strides = [1, 1]} : vector<2x104xf32> to vector<2x26xf32>
    %146 = arith.mulf %143, %129 : vector<2x26xf32>
    %147 = arith.mulf %142, %144 : vector<2x26xf32>
    %148 = arith.addf %146, %147 : vector<2x26xf32>
    %149 = math.tanh %148 : vector<2x26xf32>
    %150 = arith.mulf %145, %149 : vector<2x26xf32>
    %151 = vector.extract_strided_slice %150 {offsets = [0, 0], sizes = [2, 13], strides = [1, 1]} : vector<2x26xf32> to vector<2x13xf32>
    %152 = vector.extract_strided_slice %150 {offsets = [0, 13], sizes = [2, 13], strides = [1, 1]} : vector<2x26xf32> to vector<2x13xf32>
    %cst_29 = arith.constant dense<0.000000e+00> : vector<2x104xf32>
    %153 = tpu.matmul %150, %74, %cst_29 {dimension_numbers = #tpu.dot_dimension_numbers<[1], [0], [0], [1], [0, 0, 1, 1], [], []>} : vector<2x26xf32>, vector<26x104xf32>, vector<2x104xf32> -> vector<2x104xf32>
    %154 = arith.addf %153, %58 : vector<2x104xf32>
    %155 = arith.negf %154 : vector<2x104xf32>
    %156 = math.exp %155 : vector<2x104xf32>
    %cst_30 = arith.constant 1.000000e+00 : f32
    %157 = vector.broadcast %cst_30 : f32 to vector<2x104xf32>
    %158 = arith.addf %157, %156 : vector<2x104xf32>
    %159 = arith.divf %157, %158 : vector<2x104xf32>
    %160 = math.tanh %154 : vector<2x104xf32>
    %161 = vector.extract_strided_slice %159 {offsets = [0, 0], sizes = [2, 26], strides = [1, 1]} : vector<2x104xf32> to vector<2x26xf32>
    %162 = vector.extract_strided_slice %159 {offsets = [0, 26], sizes = [2, 26], strides = [1, 1]} : vector<2x104xf32> to vector<2x26xf32>
    %163 = vector.extract_strided_slice %160 {offsets = [0, 52], sizes = [2, 26], strides = [1, 1]} : vector<2x104xf32> to vector<2x26xf32>
    %164 = vector.extract_strided_slice %159 {offsets = [0, 78], sizes = [2, 26], strides = [1, 1]} : vector<2x104xf32> to vector<2x26xf32>
    %165 = arith.mulf %162, %148 : vector<2x26xf32>
    %166 = arith.mulf %161, %163 : vector<2x26xf32>
    %167 = arith.addf %165, %166 : vector<2x26xf32>
    %168 = math.tanh %167 : vector<2x26xf32>
    %169 = arith.mulf %164, %168 : vector<2x26xf32>
    %170 = vector.extract_strided_slice %169 {offsets = [0, 0], sizes = [2, 13], strides = [1, 1]} : vector<2x26xf32> to vector<2x13xf32>
    %171 = vector.extract_strided_slice %169 {offsets = [0, 13], sizes = [2, 13], strides = [1, 1]} : vector<2x26xf32> to vector<2x13xf32>
    %cst_31 = arith.constant dense<0.000000e+00> : vector<2x104xf32>
    %172 = tpu.matmul %169, %74, %cst_31 {dimension_numbers = #tpu.dot_dimension_numbers<[1], [0], [0], [1], [0, 0, 1, 1], [], []>} : vector<2x26xf32>, vector<26x104xf32>, vector<2x104xf32> -> vector<2x104xf32>
    %173 = arith.addf %172, %63 : vector<2x104xf32>
    %174 = arith.negf %173 : vector<2x104xf32>
    %175 = math.exp %174 : vector<2x104xf32>
    %cst_32 = arith.constant 1.000000e+00 : f32
    %176 = vector.broadcast %cst_32 : f32 to vector<2x104xf32>
    %177 = arith.addf %176, %175 : vector<2x104xf32>
    %178 = arith.divf %176, %177 : vector<2x104xf32>
    %179 = math.tanh %173 : vector<2x104xf32>
    %180 = vector.extract_strided_slice %178 {offsets = [0, 0], sizes = [2, 26], strides = [1, 1]} : vector<2x104xf32> to vector<2x26xf32>
    %181 = vector.extract_strided_slice %178 {offsets = [0, 26], sizes = [2, 26], strides = [1, 1]} : vector<2x104xf32> to vector<2x26xf32>
    %182 = vector.extract_strided_slice %179 {offsets = [0, 52], sizes = [2, 26], strides = [1, 1]} : vector<2x104xf32> to vector<2x26xf32>
    %183 = vector.extract_strided_slice %178 {offsets = [0, 78], sizes = [2, 26], strides = [1, 1]} : vector<2x104xf32> to vector<2x26xf32>
    %184 = arith.mulf %181, %167 : vector<2x26xf32>
    %185 = arith.mulf %180, %182 : vector<2x26xf32>
    %186 = arith.addf %184, %185 : vector<2x26xf32>
    %187 = math.tanh %186 : vector<2x26xf32>
    %188 = arith.mulf %183, %187 : vector<2x26xf32>
    %189 = vector.extract_strided_slice %188 {offsets = [0, 0], sizes = [2, 13], strides = [1, 1]} : vector<2x26xf32> to vector<2x13xf32>
    %190 = vector.extract_strided_slice %188 {offsets = [0, 13], sizes = [2, 13], strides = [1, 1]} : vector<2x26xf32> to vector<2x13xf32>
    %cst_33 = arith.constant dense<0.000000e+00> : vector<2x104xf32>
    %191 = tpu.matmul %188, %74, %cst_33 {dimension_numbers = #tpu.dot_dimension_numbers<[1], [0], [0], [1], [0, 0, 1, 1], [], []>} : vector<2x26xf32>, vector<26x104xf32>, vector<2x104xf32> -> vector<2x104xf32>
    %192 = arith.addf %191, %68 : vector<2x104xf32>
    %193 = arith.negf %192 : vector<2x104xf32>
    %194 = math.exp %193 : vector<2x104xf32>
    %cst_34 = arith.constant 1.000000e+00 : f32
    %195 = vector.broadcast %cst_34 : f32 to vector<2x104xf32>
    %196 = arith.addf %195, %194 : vector<2x104xf32>
    %197 = arith.divf %195, %196 : vector<2x104xf32>
    %198 = math.tanh %192 : vector<2x104xf32>
    %199 = vector.extract_strided_slice %197 {offsets = [0, 0], sizes = [2, 26], strides = [1, 1]} : vector<2x104xf32> to vector<2x26xf32>
    %200 = vector.extract_strided_slice %197 {offsets = [0, 26], sizes = [2, 26], strides = [1, 1]} : vector<2x104xf32> to vector<2x26xf32>
    %201 = vector.extract_strided_slice %198 {offsets = [0, 52], sizes = [2, 26], strides = [1, 1]} : vector<2x104xf32> to vector<2x26xf32>
    %202 = vector.extract_strided_slice %197 {offsets = [0, 78], sizes = [2, 26], strides = [1, 1]} : vector<2x104xf32> to vector<2x26xf32>
    %203 = arith.mulf %200, %186 : vector<2x26xf32>
    %204 = arith.mulf %199, %201 : vector<2x26xf32>
    %205 = arith.addf %203, %204 : vector<2x26xf32>
    %206 = math.tanh %205 : vector<2x26xf32>
    %207 = arith.mulf %202, %206 : vector<2x26xf32>
    %208 = vector.extract_strided_slice %207 {offsets = [0, 0], sizes = [2, 13], strides = [1, 1]} : vector<2x26xf32> to vector<2x13xf32>
    %209 = vector.extract_strided_slice %207 {offsets = [0, 13], sizes = [2, 13], strides = [1, 1]} : vector<2x26xf32> to vector<2x13xf32>
    %cst_35 = arith.constant dense<0.000000e+00> : vector<2x104xf32>
    %210 = tpu.matmul %207, %74, %cst_35 {dimension_numbers = #tpu.dot_dimension_numbers<[1], [0], [0], [1], [0, 0, 1, 1], [], []>} : vector<2x26xf32>, vector<26x104xf32>, vector<2x104xf32> -> vector<2x104xf32>
    %211 = arith.addf %210, %73 : vector<2x104xf32>
    %212 = arith.negf %211 : vector<2x104xf32>
    %213 = math.exp %212 : vector<2x104xf32>
    %cst_36 = arith.constant 1.000000e+00 : f32
    %214 = vector.broadcast %cst_36 : f32 to vector<2x104xf32>
    %215 = arith.addf %214, %213 : vector<2x104xf32>
    %216 = arith.divf %214, %215 : vector<2x104xf32>
    %217 = math.tanh %211 : vector<2x104xf32>
    %218 = vector.extract_strided_slice %216 {offsets = [0, 0], sizes = [2, 26], strides = [1, 1]} : vector<2x104xf32> to vector<2x26xf32>
    %219 = vector.extract_strided_slice %216 {offsets = [0, 26], sizes = [2, 26], strides = [1, 1]} : vector<2x104xf32> to vector<2x26xf32>
    %220 = vector.extract_strided_slice %217 {offsets = [0, 52], sizes = [2, 26], strides = [1, 1]} : vector<2x104xf32> to vector<2x26xf32>
    %221 = vector.extract_strided_slice %216 {offsets = [0, 78], sizes = [2, 26], strides = [1, 1]} : vector<2x104xf32> to vector<2x26xf32>
    %222 = arith.mulf %219, %205 : vector<2x26xf32>
    %223 = arith.mulf %218, %220 : vector<2x26xf32>
    %224 = arith.addf %222, %223 : vector<2x26xf32>
    %225 = math.tanh %224 : vector<2x26xf32>
    %226 = arith.mulf %221, %225 : vector<2x26xf32>
    %227 = vector.extract_strided_slice %226 {offsets = [0, 0], sizes = [2, 13], strides = [1, 1]} : vector<2x26xf32> to vector<2x13xf32>
    %228 = vector.extract_strided_slice %226 {offsets = [0, 13], sizes = [2, 13], strides = [1, 1]} : vector<2x26xf32> to vector<2x13xf32>
    %229 = vector.shape_cast %94 : vector<2x13xf32> to vector<2x1x13xf32>
    %230 = vector.shape_cast %113 : vector<2x13xf32> to vector<2x1x13xf32>
    %231 = vector.shape_cast %132 : vector<2x13xf32> to vector<2x1x13xf32>
    %232 = vector.shape_cast %151 : vector<2x13xf32> to vector<2x1x13xf32>
    %233 = vector.shape_cast %170 : vector<2x13xf32> to vector<2x1x13xf32>
    %234 = vector.shape_cast %189 : vector<2x13xf32> to vector<2x1x13xf32>
    %235 = vector.shape_cast %208 : vector<2x13xf32> to vector<2x1x13xf32>
    %236 = vector.shape_cast %227 : vector<2x13xf32> to vector<2x1x13xf32>
    %237 = tpu.concatenate %229, %230, %231, %232, %233, %234, %235, %236 in 1 : vector<2x1x13xf32>, vector<2x1x13xf32>, vector<2x1x13xf32>, vector<2x1x13xf32>, vector<2x1x13xf32>, vector<2x1x13xf32>, vector<2x1x13xf32>, vector<2x1x13xf32> -> vector<2x8x13xf32>
    %238 = vector.shape_cast %228 : vector<2x13xf32> to vector<2x1x13xf32>
    %239 = vector.shape_cast %209 : vector<2x13xf32> to vector<2x1x13xf32>
    %240 = vector.shape_cast %190 : vector<2x13xf32> to vector<2x1x13xf32>
    %241 = vector.shape_cast %171 : vector<2x13xf32> to vector<2x1x13xf32>
    %242 = vector.shape_cast %152 : vector<2x13xf32> to vector<2x1x13xf32>
    %243 = vector.shape_cast %133 : vector<2x13xf32> to vector<2x1x13xf32>
    %244 = vector.shape_cast %114 : vector<2x13xf32> to vector<2x1x13xf32>
    %245 = vector.shape_cast %95 : vector<2x13xf32> to vector<2x1x13xf32>
    %246 = tpu.concatenate %238, %239, %240, %241, %242, %243, %244, %245 in 1 : vector<2x1x13xf32>, vector<2x1x13xf32>, vector<2x1x13xf32>, vector<2x1x13xf32>, vector<2x1x13xf32>, vector<2x1x13xf32>, vector<2x1x13xf32>, vector<2x1x13xf32> -> vector<2x8x13xf32>
    %247 = tpu.concatenate %237, %246 in 2 : vector<2x8x13xf32>, vector<2x8x13xf32> -> vector<2x8x26xf32>
    %c0_37 = arith.constant 0 : index
    %c0_38 = arith.constant 0 : index
    %c0_39 = arith.constant 0 : index
    %248 = vector.load %arg7[%c0_37, %c0_38, %c0_39] : memref<2x8x26xf32, #tpu.memory_space<vmem>>, vector<2x8x26xf32>
    tpu.vector_store %arg7[%c0_37, %c0_38, %c0_39], %247 {strides = array<i32>} : memref<2x8x26xf32, #tpu.memory_space<vmem>>, vector<2x8x26xf32>,
    %249 = vector.shape_cast %226 : vector<2x26xf32> to vector<1x2x26xf32>
    %250 = vector.shape_cast %224 : vector<2x26xf32> to vector<1x2x26xf32>
    %251 = tpu.concatenate %249, %250 in 0 : vector<1x2x26xf32>, vector<1x2x26xf32> -> vector<2x2x26xf32>
    %c0_40 = arith.constant 0 : index
    %c0_41 = arith.constant 0 : index
    %c0_42 = arith.constant 0 : index
    %252 = vector.load %arg8[%c0_40, %c0_41, %c0_42] : memref<2x2x26xf32, #tpu.memory_space<vmem>>, vector<2x2x26xf32>
    tpu.vector_store %arg8[%c0_40, %c0_41, %c0_42], %251 {strides = array<i32>} : memref<2x2x26xf32, #tpu.memory_space<vmem>>, vector<2x2x26xf32>,
    return
  }
}

</mosaic_0001>

<bundles_post_ra>
// kernel: tpu_custom_call.1
= control target key start
LH: loop header
LB: loop body
LE: loop exit
PB: predicated region body
PF: predicated region fallthrough
CT: control target
= control target key end

     0   :  { %14 = vsyncpa [#allocation3], 0  ;;  %s1601_s0 = inlined_call_operand.hbm [shape: f32[16,13], index: 0, kind: input, shape index: {}]   ;;  %s1602_s1 = inlined_call_operand.hbm [shape: f32[1,13], index: 1, kind: input, shape index: {}]   ;;  %s1603_s2 = inlined_call_operand.vmem [shape: f32[1,13], index: 2, kind: input, shape index: {}]   ;;  %s1604_s3 = inlined_call_operand.hbm [shape: f32[13,104], index: 3, kind: input, shape index: {}]   ;;  %s1605_s4 = inlined_call_operand.hbm [shape: f32[13,104], index: 4, kind: input, shape index: {}]   ;;  %s1606_s5 = inlined_call_operand.hbm [shape: f32[26,104], index: 5, kind: input, shape index: {}]   ;;  %s1607_s6 = inlined_call_operand.vmem [shape: f32[1,104], index: 6, kind: input, shape index: {}]   ;;  %s1608_s7 = inlined_call_operand.hbm [shape: f32[2,8,26], index: 7, kind: output, shape index: {0}]   ;;  %s1609_s8 = inlined_call_operand.hbm [shape: f32[2,2,26], index: 8, kind: output, shape index: {1}]  }
   0x1   :  { %15 = vsyncpa [#allocation6], 0 }
   0x2   :  { %16 = vsyncpa [#allocation9], 0 }
   0x3   :  { %17 = vsyncpa [#allocation4], 0  ;;  %s37_s29 = sshll.u32 %s1602_s1, 4  ;;  %s38_s29 = int_to_ptr.hbm [resolvable:$true] %s37_s29 }
   0x4   :  { %18 = vsyncpa [#allocation13], 0  ;;  %s1251_s30 = smov [#allocation5]   ;;  %s62_s12 = sshll.u32 %s1605_s4, 4  ;;  %s63_s12 = int_to_ptr.hbm [resolvable:$true] %s62_s12 }
   0x5   :  { %s39_s9 = sshll.u32 %s1251_s30, 4  ;;  %s1252_s13 = smov [#allocation8]   ;;  %s40_s9 = int_to_ptr.vmem [resolvable:$true] %s39_s9 }
   0x6   :  { %42 = dma.hbm_to_vmem [thread:$0]  %s38_s29, 16, %s40_s9, [#allocation6]  }
   0x7   :  { %s64_s14 = sshll.u32 %s1252_s13, 4  ;;  %s23_s17 = sshll.u32 %s1601_s0, 4  ;;  %s65_s14 = int_to_ptr.vmem [resolvable:$true] %s64_s14  ;;  %s24_s17 = int_to_ptr.hbm [resolvable:$true] %s23_s17 }
   0x8   :  { %s1253_s1 = smov 128   ;;  %s1254_s18 = smov 8  }
   0x9   :  { %70 = dma.hbm_to_vmem [thread:$0]  %s63_s12, 256, %s65_s14, [#allocation9], %s1253_s1, %s1253_s1, %s1254_s18  }
   0xa   :  { %s49_s21 = sshll.u32 %s1604_s3, 4  ;;  %s1255_s4 = smov [#allocation2]   ;;  %s50_s21 = int_to_ptr.hbm [resolvable:$true] %s49_s21 }
   0xb   :  { %s25_s22 = sshll.u32 %s1255_s4, 4  ;;  %s1256_s0 = smov [#allocation7]   ;;  %s26_s22 = int_to_ptr.vmem [resolvable:$true] %s25_s22 }
   0xc   :  { %31 = dma.hbm_to_vmem [thread:$0]  %s24_s17, 256, %s26_s22, [#allocation3], %s1253_s1, %s1253_s1, %s1254_s18  }
   0xd   :  { %s51_s23 = sshll.u32 %s1256_s0, 4  ;;  %s75_s26 = sshll.u32 %s1606_s5, 4  ;;  %s52_s23 = int_to_ptr.vmem [resolvable:$true] %s51_s23  ;;  %s76_s26 = int_to_ptr.hbm [resolvable:$true] %s75_s26 }
   0xe   :  { %57 = dma.hbm_to_vmem [thread:$0]  %s50_s21, 256, %s52_s23, [#allocation6], %s1253_s1, %s1253_s1, %s1254_s18  }
   0xf   :  { %s1257_s3 = smov [#allocation10]  }
  0x10   :  { %s77_s27 = sshll.u32 %s1257_s3, 4  ;;  %s78_s27 = int_to_ptr.vmem [resolvable:$true] %s77_s27 }
  0x11   :  { %83 = dma.hbm_to_vmem [thread:$0]  %s76_s26, 512, %s78_s27, [#allocation9], %s1253_s1, %s1253_s1, %s1254_s18  }
  0x12   :  { %1241 = dma.done.wait [#allocation3], 256  }
  0x13   :  { %1242 = vsyncadd [#allocation3], 4294967040 }
  0x14   :  { %1243 = dma.done.wait [#allocation6], 272  }
  0x15   :  { %1244 = vsyncadd [#allocation6], 4294967024 }
  0x16   :  { %1245 = dma.done.wait [#allocation9], 768  }
  0x17   :  { %1246 = vsyncadd [#allocation9], 4294966528  ;;  %vm108_vm0 = vcmask 105472   ;;  %v106_v0 = vld [vmem:[#allocation2] sm:$0xff]  ;;  %v107_v2 = vld [vmem:[#allocation2 + $0x8] sm:$0xff]  ;;  %v1258_v4 = vmov 13.0  }
  0x18   :  { %v109_v1 = vsel %vm108_vm0, %v106_v0, 0.0  ;;  %v112_v3 = vsel %vm108_vm0, %v107_v2, 0.0  ;;  %1003 = vrcp.f32 %v1258_v4  ;;  %v173_v21 = vld [vmem:[#allocation7 + $0x8] sm:$0x1f]  ;;  %vm184_vm2 = vcmask 1044480   ;;  %v172_v23 = vld [vmem:[#allocation7] sm:$0xff] }
  0x19   :  { %110 = vadd.xlane.f32.xlu0 %v109_v1  ;;  %v212_v22 = vld [vmem:[#allocation8 + $0x8] sm:$0x1f]  ;;  %954 = vmatpush.msk.msra.mxu0 %vm184_vm2, %v173_v21  ;;  %v211_v24 = vld [vmem:[#allocation8] sm:$0xff]  ;;  %vm279_vm3 = vcmask 1041408   ;;  %v1362_v28 = vld [vmem:[#allocation10 + $0x8] sm:$0xff]  ;;  %v1259_v32 = vmov 0.0  }
  0x1a   :  { %957 = vmatpush.msk.msra.mxu1 %vm184_vm2, %v212_v22  ;;  %v1354_v25 = vld [vmem:[#allocation10 + $0x18] sm:$0x3]  ;;  %v1356_v26 = vld [vmem:[#allocation10 + $0x10] sm:$0xff]  ;;  %v1374_v31 = vld [vmem:[#allocation10] sm:$0xff]  ;;  %vm272_vm10 = vcmask 1041409   ;;  %s1261_s30 = smov 26  }
  0x1b   :  { %203 = vmatpush.msra.mxu0 %v172_v23  ;;  %960 = vmatpush.msk.msra.mxu2 %vm279_vm3, %v1354_v25  ;;  %v1000_v44 = vld [vmem:[#allocation5] ss:$0 sm:$0xff]  ;;  %v1001_v48 = vld [vmem:[%s1603_s2] ss:$0 sm:$0xff]  ;;  %s1262_s9 = smov 52   ;;  %s1263_s10 = smov 50  }
  0x1c   :  { %231 = vmatpush.msra.mxu1 %v211_v24  ;;  %962 = vmatpush.msk.msra.mxu3 %vm279_vm3, %v1354_v25  ;;  %v1002_v58 = vld [vmem:[%s1607_s6] ss:$0 sm:$0xff]  ;;  %s1260_s6 = smov 76   ;;  %vm275_vm15 = vcmask 211968   ;;  %s1264_s11 = smov [#allocation11]  }
  0x1d   :  { %971 = vmatpush.msk.msrb.mxu0 %vm279_vm3, %v1354_v25  ;;  %296 = vmatpush.msra.mxu2 %v1356_v26  ;;  %s919_s12 = sshll.u32 %s1264_s11, 4  ;;  %s921_s15 = sshll.u32 %s1608_s7, 4  ;;  %s920_s12 = int_to_ptr.vmem [resolvable:$true] %s919_s12  ;;  %s922_s15 = int_to_ptr.hbm [resolvable:$true] %s921_s15 }
  0x1e   :  { %v1004_v5 = vpop.eup %1003  ;;  %974 = vmatpush.msk.msrb.mxu1 %vm279_vm3, %v1354_v25  ;;  %363 = vmatpush.msra.mxu3 %v1356_v26  ;;  %s1265_s16 = smov [#allocation12]   ;;  %s934_s21 = sshll.u32 %s1609_s8, 4  ;;  %s935_s21 = int_to_ptr.hbm [resolvable:$true] %s934_s21 }
  0x1f   :  { %v116_v6 = vmul.f32 13.0, %v1004_v5  ;;  %vm120_vm1 = vweird.f32 %v1004_v5  ;;  %565 = vmatpush.msrb.mxu0 %v1356_v26  ;;  %297 = vmatpush.msra.mxu2 %v1362_v28  ;;  %s932_s17 = sshll.u32 %s1265_s16, 4  ;;  %s1266_s7 = smov 32   ;;  %s933_s17 = int_to_ptr.vmem [resolvable:$true] %s932_s17 }
  0x20   :  { %631 = vmatpush.msrb.mxu1 %v1356_v26  ;;  %364 = vmatpush.msra.mxu3 %v1362_v28  ;;  %s1267_s4 = smov 2  }
  0x21   :  { %113 = vadd.xlane.f32.xlu0 %v112_v3  ;;  %v117_v7 = vsub.f32 1.0, %v116_v6  ;;  %566 = vmatpush.msrb.mxu0 %v1362_v28 }
  0x22   :  { %632 = vmatpush.msrb.mxu1 %v1362_v28  ;;  %298 = vmatpush.msra.mxu2 %v1374_v31 }
  0x23   :  { %v118_v8 = vmul.f32 %v1004_v5, %v117_v7  ;;  %365 = vmatpush.msra.mxu3 %v1374_v31  ;;  %299 = vmatmul.f32.vlgmr.msra.gmra.mxu2 %v1259_v32 }
  0x24   :  { %965 = vmatpush.msk.msrb.mxu2 %vm279_vm3, %v1354_v25  ;;  %567 = vmatpush.msrb.mxu0 %v1374_v31 }
  0x25   :  { %v119_v9 = vadd.f32 %v1004_v5, %v118_v8  ;;  %968 = vmatpush.msk.msrb.mxu3 %vm279_vm3, %v1354_v25  ;;  %633 = vmatpush.msrb.mxu1 %v1374_v31 }
  0x26   :  { %431 = vmatpush.msrb.mxu2 %v1356_v26 }
  0x27   :  { %v121_v10 = vsel %vm120_vm1, %v1004_v5, %v119_v9  ;;  %499 = vmatpush.msrb.mxu3 %v1356_v26 }
  0x28   :  { %432 = vmatpush.msrb.mxu2 %v1362_v28 }
  0x29   :  { %500 = vmatpush.msrb.mxu3 %v1362_v28 }
  0x2a   :  { %433 = vmatpush.msrb.mxu2 %v1374_v31 }
  0x2b   :  { %501 = vmatpush.msrb.mxu3 %v1374_v31 }
  0x2c   :  { %977 = vmatpush.msk.msra.mxu2 %vm279_vm3, %v1354_v25 }
  0x2e   :  { %697 = vmatpush.msra.mxu2 %v1356_v26 }
  0x30   :  { %698 = vmatpush.msra.mxu2 %v1362_v28 }
  0x32   :  { %699 = vmatpush.msra.mxu2 %v1374_v31 }
  0x8c   :  { %v111_v11 = vpop.xlane.xlu0 %110 }
  0x8d   :  { %v122_v12 = vmul.f32 %v121_v10, %v111_v11 }
  0x8f   :  { %v1342_v13 = vsub.f32 %v106_v0, %v122_v12 }
  0x91   :  { %v126_v14 = vmul.f32 %v1342_v13, %v1342_v13 }
  0x93   :  { %v128_v15 = vsel %vm108_vm0, %v126_v14, 0.0 }
  0x94   :  { %129 = vadd.xlane.f32.xlu1 %v128_v15  ;;  %v114_v16 = vpop.xlane.xlu0 %113 }
  0x95   :  { %v123_v17 = vmul.f32 %v121_v10, %v114_v16 }
  0x97   :  { %v1347_v18 = vsub.f32 %v107_v2, %v123_v17 }
  0x99   :  { %v127_v19 = vmul.f32 %v1347_v18, %v1347_v18 }
  0x9b   :  { %v131_v20 = vsel %vm108_vm0, %v127_v19, 0.0 }
  0x9c   :  { %132 = vadd.xlane.f32.xlu1 %v131_v20 }
  0xa6   :  { %v300_v24 = vpop.f32.mrf.mxu2 }
 0x107   :  { %v130_v27 = vpop.xlane.xlu1 %129 }
 0x108   :  { %v134_v29 = vmul.f32 %v130_v27, %v121_v10 }
 0x10a   :  { %v136_v30 = vadd.f32 1e-05, %v134_v29 }
 0x10c   :  { %1005 = vrsqrt.f32 %v136_v30  ;;  %vm144_vm5 = vweird.f32 %v136_v30 }
 0x10f   :  { %v133_v33 = vpop.xlane.xlu1 %132 }
 0x110   :  { %v135_v34 = vmul.f32 %v133_v33, %v121_v10 }
 0x112   :  { %v1006_v35 = vpop.eup %1005  ;;  %v137_v36 = vadd.f32 1e-05, %v135_v34 }
 0x113   :  { %v139_v37 = vmul.f32 %v1006_v35, %v136_v30  ;;  %vm145_vm4 = vweird.f32 %v1006_v35 }
 0x114   :  { %1007 = vrsqrt.f32 %v137_v36  ;;  %vm146_vm6 = vmor %vm144_vm5, %vm145_vm4  ;;  %vm154_vm8 = vweird.f32 %v137_v36 }
 0x115   :  { %v140_v38 = vmul.f32 %v1006_v35, %v139_v37 }
 0x117   :  { %v141_v39 = vmul.f32 0.5, %v140_v38 }
 0x119   :  { %v142_v40 = vsub.f32 1.5, %v141_v39 }
 0x11a   :  { %v1008_v41 = vpop.eup %1007 }
 0x11b   :  { %v143_v42 = vmul.f32 %v1006_v35, %v142_v40  ;;  %v149_v43 = vmul.f32 %v1008_v41, %v137_v36  ;;  %vm155_vm7 = vweird.f32 %v1008_v41 }
 0x11c   :  { %vm156_vm9 = vmor %vm154_vm8, %vm155_vm7 }
 0x11d   :  { %v147_v45 = vsel %vm146_vm6, %v1006_v35, %v143_v42  ;;  %v150_v46 = vmul.f32 %v1008_v41, %v149_v43 }
 0x11e   :  { %v158_v47 = vmul.f32 %v147_v45, %v1342_v13 }
 0x11f   :  { %v151_v49 = vmul.f32 0.5, %v150_v46 }
 0x120   :  { %v164_v50 = vmul.f32 %v1000_v44, %v158_v47 }
 0x121   :  { %v152_v51 = vsub.f32 1.5, %v151_v49 }
 0x122   :  { %v170_v52 = vadd.f32 %v1001_v48, %v164_v50 }
 0x123   :  { %v153_v53 = vmul.f32 %v1008_v41, %v152_v51 }
 0x124   :  { %955 = vmatmul.msk.f32.vlgmr.msra.gmra.mxu0 %vm108_vm0, %v170_v52  ;;  %958 = vmatmul.msk.f32.vlgmr.msra.gmra.mxu1 %vm108_vm0, %v170_v52 }
 0x125   :  { %v157_v54 = vsel %vm156_vm9, %v1008_v41, %v153_v53 }
 0x126   :  { %v159_v55 = vmul.f32 %v157_v54, %v1347_v18 }
 0x128   :  { %v165_v56 = vmul.f32 %v1000_v44, %v159_v55 }
 0x12a   :  { %v171_v57 = vadd.f32 %v1001_v48, %v165_v56 }
 0x12c   :  { %956 = vmatmul.msk.f32.gmra.mxu0 %vm108_vm0, %v171_v57  ;;  %959 = vmatmul.msk.f32.gmra.mxu1 %vm108_vm0, %v171_v57 }
 0x1a1   :  { %v205_v59 = vpop.f32.mrf.mxu0  ;;  %v233_v60 = vpop.f32.mrf.mxu1 }
 0x1a2   :  { %v206_v61 = vadd.f32 %v1002_v58, %v205_v59  ;;  %v247_v62 = vrot.slane %v233_v60, 5  ;;  %v253_v63 = vrot.slane %v233_v60, 3  ;;  %v259_v0 = vrot.slane %v233_v60, 1 }
 0x1a3   :  { %v241_v1 = vrot.slane %v233_v60, 7 }
 0x1a4   :  { %v251_v2 = vadd.f32 %v247_v62, %v206_v61  ;;  %v257_v3 = vadd.f32 %v253_v63, %v206_v61  ;;  %v263_v4 = vadd.f32 %v259_v0, %v206_v61 }
 0x1a5   :  { %v245_v5 = vadd.f32 %v241_v1, %v206_v61 }
 0x1a6   :  { %v345_v13 = vrot.slane %v251_v2, 1  ;;  %v412_v14 = vrot.slane %v257_v3, 2  ;;  %v480_v20 = vrot.slane %v263_v4, 3  ;;  %v612_v21 = vrot.slane %v251_v2, 5 }
 0x1a7   :  { %v546_v18 = vrot.slane %v245_v5, 4  ;;  %v678_v22 = vrot.slane %v257_v3, 6  ;;  %v744_v39 = vrot.slane %v263_v4, 7 }
 0x1a9   :  { %v208_v6 = vpop.f32.mrf.mxu0  ;;  %v236_v7 = vpop.f32.mrf.mxu1 }
 0x1aa   :  { %v209_v8 = vadd.f32 %v1002_v58, %v208_v6  ;;  %v242_v9 = vrot.slane %v236_v7, 7  ;;  %v248_v10 = vrot.slane %v236_v7, 5  ;;  %v254_v11 = vrot.slane %v236_v7, 3 }
 0x1ab   :  { %v260_v12 = vrot.slane %v236_v7, 1 }
 0x1ac   :  { %v246_v15 = vadd.f32 %v242_v9, %v209_v8  ;;  %v258_v16 = vadd.f32 %v254_v11, %v209_v8  ;;  %v252_v17 = vadd.f32 %v248_v10, %v209_v8 }
 0x1ad   :  { %v264_v19 = vadd.f32 %v260_v12, %v209_v8 }
 0x1ae   :  { %v271_v23 = vrot.slane %v246_v15, 7  ;;  %v346_v27 = vsel %vm272_vm10, %v252_v17, %v345_v13  ;;  %v413_v29 = vrot.slane %v258_v16, 1  ;;  %v547_v30 = vrot.slane %v246_v15, 3 }
 0x1af   :  { %v481_v32 = vrot.slane %v264_v19, 2  ;;  %v613_v33 = vrot.slane %v252_v17, 4  ;;  %v679_v34 = vrot.slane %v258_v16, 5  ;;  %v745_v35 = vrot.slane %v264_v19, 6 }
 0x1b0   :  { %v273_v36 = vsel %vm272_vm10, %v271_v23, %v245_v5  ;;  %v1412_v37 = vsel %vm272_vm10, %v413_v29, %v412_v14  ;;  %v1415_v38 = vsel %vm272_vm10, %v547_v30, %v546_v18 }
 0x1b1   :  { %v301_v40 = vadd.f32 %v300_v24, %v273_v36  ;;  %v1418_v41 = vsel %vm272_vm10, %v481_v32, %v480_v20  ;;  %v1421_v42 = vsel %vm272_vm10, %v613_v33, %v612_v21  ;;  %v1424_v43 = vsel %vm272_vm10, %v679_v34, %v678_v22 }
 0x1b2   :  { %v1427_v44 = vsel %vm272_vm10, %v745_v35, %v744_v39 }
 0x1b3   :  { %1009 = vtanh.f32 %v301_v40  ;;  %v961_v46 = vmul.f32 -1.442695, %v301_v40 }
 0x1b5   :  { %1011 = vpow2.f32 %v961_v46 }
 0x1b9   :  { %v1010_v45 = vpop.eup %1009 }
 0x1ba   :  { %325 = vrot.lane.b32.xlu2 %v1010_v45, %s1260_s6 }
 0x1bb   :  { %v1012_v47 = vpop.eup %1011 }
 0x1bc   :  { %v306_v48 = vadd.f32 1.0, %v1012_v47 }
 0x1be   :  { %1013 = vrcp.f32 %v306_v48  ;;  %v318_v54 = vand.u32 2147483648, %v306_v48  ;;  %vm312_vm12 = vweird.f32 %v306_v48  ;;  %v316_v55 = vand.u32 2147483647, %v306_v48 }
 0x1c0   :  { %v319_v57 = vor.u32 1.1754944e-38, %v318_v54  ;;  %vm317_vm14 = vcmp.eq.f32.partialorder %v316_v55, 8.507059e+37 }
 0x1c4   :  { %v1014_v49 = vpop.eup %1013 }
 0x1c5   :  { %v308_v50 = vmul.f32 %v1014_v49, %v306_v48  ;;  %vm313_vm11 = vweird.f32 %v1014_v49 }
 0x1c6   :  { %vm314_vm13 = vmor %vm312_vm12, %vm313_vm11  ;;  %vm845_vm11 = vcmask 1040384  }
 0x1c7   :  { %v309_v51 = vsub.f32 1.0, %v308_v50 }
 0x1c9   :  { %v310_v52 = vmul.f32 %v1014_v49, %v309_v51 }
 0x1cb   :  { %v311_v53 = vadd.f32 %v1014_v49, %v310_v52 }
 0x1cd   :  { %v315_v56 = vsel %vm314_vm13, %v1014_v49, %v311_v53 }
 0x1ce   :  { %v320_v59 = vsel %vm317_vm14, %v319_v57, %v315_v56 }
 0x1cf   :  { %v323_v61 = vmul.f32 0.0, %v320_v59 }
 0x214   :  { %v326_v58 = vpop.permute.xlu2 %325 }
 0x215   :  { %v328_v60 = vmul.f32 %v326_v58, %v320_v59 }
 0x217   :  { %330 = vrot.lane.b32.xlu2 %v328_v60, %s1261_s30 }
 0x271   :  { %v331_v62 = vpop.permute.xlu2 %330 }
 0x272   :  { %v333_v63 = vadd.f32 %v331_v62, %v323_v61 }
 0x274   :  { %1015 = vtanh.f32 %v333_v63 }
 0x27a   :  { %v1016_v0 = vpop.eup %1015 }
 0x27b   :  { %336 = vrot.lane.b32.xlu0 %v1016_v0, %s1262_s9 }
 0x2ed   :  { %v337_v1 = vpop.permute.xlu0 %336 }
 0x2ee   :  { %v1432_v2 = vmul.f32 %v337_v1, %v320_v59 }
 0x2f0   :  { %341 = vrot.lane.b32.xlu1 %v1432_v2, %s1263_s10 }
 0x362   :  { %v342_v3 = vpop.permute.xlu1 %341 }
 0x363   :  { %963 = vmatmul.msk.f32.vlgmr.msra.gmra.mxu3 %vm275_vm15, %v342_v3 }
 0x364   :  { %980 = vmatpush.msk.msra.mxu3 %vm279_vm3, %v1354_v25 }
 0x366   :  { %763 = vmatpush.msra.mxu3 %v1356_v26 }
 0x368   :  { %764 = vmatpush.msra.mxu3 %v1362_v28 }
 0x36a   :  { %765 = vmatpush.msra.mxu3 %v1374_v31 }
 0x3e6   :  { %v367_v4 = vpop.f32.mrf.mxu3 }
 0x3e7   :  { %v368_v5 = vadd.f32 %v367_v4, %v346_v27 }
 0x3e9   :  { %1017 = vtanh.f32 %v368_v5  ;;  %v964_v7 = vmul.f32 -1.442695, %v368_v5 }
 0x3eb   :  { %1019 = vpow2.f32 %v964_v7 }
 0x3ef   :  { %v1018_v6 = vpop.eup %1017 }
 0x3f0   :  { %392 = vrot.lane.b32.xlu2 %v1018_v6, %s1260_s6 }
 0x3f1   :  { %v1020_v8 = vpop.eup %1019 }
 0x3f2   :  { %v373_v9 = vadd.f32 1.0, %v1020_v8 }
 0x3f4   :  { %1021 = vrcp.f32 %v373_v9  ;;  %v385_v28 = vand.u32 2147483648, %v373_v9  ;;  %vm379_vm4 = vweird.f32 %v373_v9  ;;  %v383_v31 = vand.u32 2147483647, %v373_v9 }
 0x3f6   :  { %v386_v14 = vor.u32 1.1754944e-38, %v385_v28  ;;  %vm384_vm6 = vcmp.eq.f32.partialorder %v383_v31, 8.507059e+37 }
 0x3fa   :  { %v1022_v10 = vpop.eup %1021 }
 0x3fb   :  { %v375_v11 = vmul.f32 %v1022_v10, %v373_v9  ;;  %vm380_vm1 = vweird.f32 %v1022_v10 }
 0x3fc   :  { %vm381_vm5 = vmor %vm379_vm4, %vm380_vm1  ;;  %vm850_vm4 = vcmask 1042432  }
 0x3fd   :  { %v376_v25 = vsub.f32 1.0, %v375_v11 }
 0x3ff   :  { %v377_v12 = vmul.f32 %v1022_v10, %v376_v25 }
 0x401   :  { %v378_v26 = vadd.f32 %v1022_v10, %v377_v12 }
 0x403   :  { %v382_v13 = vsel %vm381_vm5, %v1022_v10, %v378_v26 }
 0x404   :  { %v387_v16 = vsel %vm384_vm6, %v386_v14, %v382_v13 }
 0x405   :  { %v390_v18 = vmul.f32 %v387_v16, %v333_v63  ;;  %v807_v63 = vrot.slane %v1432_v2, 1 }
 0x44a   :  { %v393_v15 = vpop.permute.xlu2 %392 }
 0x44b   :  { %v395_v17 = vmul.f32 %v393_v15, %v387_v16 }
 0x44d   :  { %397 = vrot.lane.b32.xlu2 %v395_v17, %s1261_s30 }
 0x4a7   :  { %v398_v19 = vpop.permute.xlu2 %397 }
 0x4a8   :  { %v400_v20 = vadd.f32 %v398_v19, %v390_v18 }
 0x4aa   :  { %1023 = vtanh.f32 %v400_v20 }
 0x4b0   :  { %v1024_v21 = vpop.eup %1023 }
 0x4b1   :  { %403 = vrot.lane.b32.xlu2 %v1024_v21, %s1262_s9 }
 0x50b   :  { %v404_v22 = vpop.permute.xlu2 %403 }
 0x50c   :  { %v1445_v23 = vmul.f32 %v404_v22, %v387_v16 }
 0x50e   :  { %408 = vrot.lane.b32.xlu0 %v1445_v23, %s1263_s10  ;;  %v809_v56 = vrot.slane %v1445_v23, 1  ;;  %v817_v57 = vperm.slane %v1445_v23, 0 }
 0x510   :  { %v1458_v60 = vperm.slane %v809_v56, 0  ;;  %v846_v0 = vsel %vm845_vm11, %v1432_v2, %v817_v57 }
 0x512   :  { %v847_v4 = vsel %vm845_vm11, %v807_v63, %v1458_v60 }
 0x580   :  { %v409_v24 = vpop.permute.xlu0 %408 }
 0x581   :  { %966 = vmatmul.msk.f32.vlgmr.msrb.gmra.mxu2 %vm275_vm15, %v409_v24 }
 0x604   :  { %v435_v27 = vpop.f32.mrf.mxu2 }
 0x605   :  { %v436_v29 = vadd.f32 %v435_v27, %v1412_v37 }
 0x607   :  { %1025 = vtanh.f32 %v436_v29  ;;  %v967_v32 = vmul.f32 -1.442695, %v436_v29 }
 0x609   :  { %1027 = vpow2.f32 %v967_v32 }
 0x60d   :  { %v1026_v30 = vpop.eup %1025 }
 0x60e   :  { %460 = vrot.lane.b32.xlu2 %v1026_v30, %s1260_s6 }
 0x60f   :  { %v1028_v33 = vpop.eup %1027 }
 0x610   :  { %v441_v34 = vadd.f32 1.0, %v1028_v33 }
 0x612   :  { %1029 = vrcp.f32 %v441_v34  ;;  %v453_v46 = vand.u32 2147483648, %v441_v34  ;;  %vm447_vm8 = vweird.f32 %v441_v34  ;;  %v451_v47 = vand.u32 2147483647, %v441_v34 }
 0x614   :  { %v454_v48 = vor.u32 1.1754944e-38, %v453_v46  ;;  %vm452_vm10 = vcmp.eq.f32.partialorder %v451_v47, 8.507059e+37 }
 0x618   :  { %v1030_v35 = vpop.eup %1029 }
 0x619   :  { %v443_v36 = vmul.f32 %v1030_v35, %v441_v34  ;;  %vm448_vm7 = vweird.f32 %v1030_v35 }
 0x61a   :  { %vm449_vm9 = vmor %vm447_vm8, %vm448_vm7 }
 0x61b   :  { %v444_v39 = vsub.f32 1.0, %v443_v36 }
 0x61d   :  { %v445_v40 = vmul.f32 %v1030_v35, %v444_v39 }
 0x61f   :  { %v446_v45 = vadd.f32 %v1030_v35, %v445_v40 }
 0x621   :  { %v450_v37 = vsel %vm449_vm9, %v1030_v35, %v446_v45  ;;  %vm853_vm9 = vcmask 1043456  }
 0x622   :  { %v455_v50 = vsel %vm452_vm10, %v454_v48, %v450_v37 }
 0x623   :  { %v458_v52 = vmul.f32 %v455_v50, %v400_v20 }
 0x668   :  { %v461_v49 = vpop.permute.xlu2 %460 }
 0x669   :  { %v463_v51 = vmul.f32 %v461_v49, %v455_v50 }
 0x66b   :  { %465 = vrot.lane.b32.xlu1 %v463_v51, %s1261_s30 }
 0x6dd   :  { %v466_v53 = vpop.permute.xlu1 %465 }
 0x6de   :  { %v468_v54 = vadd.f32 %v466_v53, %v458_v52 }
 0x6e0   :  { %1031 = vtanh.f32 %v468_v54 }
 0x6e6   :  { %v1032_v55 = vpop.eup %1031 }
 0x6e7   :  { %471 = vrot.lane.b32.xlu0 %v1032_v55, %s1262_s9 }
 0x759   :  { %v472_v58 = vpop.permute.xlu0 %471 }
 0x75a   :  { %v1456_v59 = vmul.f32 %v472_v58, %v455_v50 }
 0x75c   :  { %v810_v61 = vrot.slane %v1456_v59, 1  ;;  %v821_v62 = vperm.slane %v1456_v59, 0  ;;  %476 = vrot.lane.b32.xlu2 %v1456_v59, %s1263_s10 }
 0x75e   :  { %v1469_v1 = vperm.slane %v810_v61, 0  ;;  %v848_v3 = vsel %vm279_vm3, %v846_v0, %v821_v62 }
 0x760   :  { %v849_v5 = vsel %vm279_vm3, %v847_v4, %v1469_v1 }
 0x7b6   :  { %v477_v6 = vpop.permute.xlu2 %476 }
 0x7b7   :  { %969 = vmatmul.msk.f32.vlgmr.msrb.gmra.mxu3 %vm275_vm15, %v477_v6 }
 0x83a   :  { %v503_v7 = vpop.f32.mrf.mxu3 }
 0x83b   :  { %v504_v8 = vadd.f32 %v503_v7, %v1418_v41 }
 0x83d   :  { %1033 = vtanh.f32 %v504_v8  ;;  %v970_v10 = vmul.f32 -1.442695, %v504_v8 }
 0x83f   :  { %1035 = vpow2.f32 %v970_v10 }
 0x843   :  { %v1034_v9 = vpop.eup %1033 }
 0x844   :  { %528 = vrot.lane.b32.xlu1 %v1034_v9, %s1260_s6 }
 0x845   :  { %v1036_v11 = vpop.eup %1035 }
 0x846   :  { %v509_v25 = vadd.f32 1.0, %v1036_v11 }
 0x848   :  { %1037 = vrcp.f32 %v509_v25  ;;  %v521_v14 = vand.u32 2147483648, %v509_v25  ;;  %vm515_vm13 = vweird.f32 %v509_v25  ;;  %v519_v15 = vand.u32 2147483647, %v509_v25 }
 0x84a   :  { %v522_v16 = vor.u32 1.1754944e-38, %v521_v14  ;;  %vm520_vm1 = vcmp.eq.f32.partialorder %v519_v15, 8.507059e+37 }
 0x84e   :  { %v1038_v12 = vpop.eup %1037 }
 0x84f   :  { %v511_v26 = vmul.f32 %v1038_v12, %v509_v25  ;;  %vm516_vm12 = vweird.f32 %v1038_v12 }
 0x850   :  { %vm517_vm14 = vmor %vm515_vm13, %vm516_vm12 }
 0x851   :  { %v512_v28 = vsub.f32 1.0, %v511_v26 }
 0x853   :  { %v513_v31 = vmul.f32 %v1038_v12, %v512_v28 }
 0x855   :  { %v514_v13 = vadd.f32 %v1038_v12, %v513_v31 }
 0x857   :  { %v518_v41 = vsel %vm517_vm14, %v1038_v12, %v514_v13 }
 0x858   :  { %v523_v18 = vsel %vm520_vm1, %v522_v16, %v518_v41 }
 0x859   :  { %v526_v20 = vmul.f32 %v523_v18, %v468_v54 }
 0x8b6   :  { %v529_v17 = vpop.permute.xlu1 %528 }
 0x8b7   :  { %v531_v19 = vmul.f32 %v529_v17, %v523_v18 }
 0x8b9   :  { %533 = vrot.lane.b32.xlu0 %v531_v19, %s1261_s30 }
 0x92b   :  { %v534_v21 = vpop.permute.xlu0 %533 }
 0x92c   :  { %v536_v22 = vadd.f32 %v534_v21, %v526_v20 }
 0x92e   :  { %1039 = vtanh.f32 %v536_v22 }
 0x934   :  { %v1040_v24 = vpop.eup %1039 }
 0x935   :  { %539 = vrot.lane.b32.xlu2 %v1040_v24, %s1262_s9 }
 0x98f   :  { %v540_v27 = vpop.permute.xlu2 %539 }
 0x990   :  { %v1485_v29 = vmul.f32 %v540_v27, %v523_v18 }
 0x992   :  { %v811_v30 = vrot.slane %v1485_v29, 1  ;;  %v825_v32 = vperm.slane %v1485_v29, 0  ;;  %544 = vrot.lane.b32.xlu1 %v1485_v29, %s1263_s10 }
 0x994   :  { %v1491_v33 = vperm.slane %v811_v30, 0  ;;  %v851_v34 = vsel %vm850_vm4, %v848_v3, %v825_v32 }
 0x996   :  { %v852_v35 = vsel %vm850_vm4, %v849_v5, %v1491_v33 }
 0xa04   :  { %v545_v36 = vpop.permute.xlu1 %544 }
 0xa05   :  { %972 = vmatmul.msk.f32.vlgmr.msrb.gmra.mxu0 %vm275_vm15, %v545_v36 }
 0xa82   :  { %v569_v39 = vpop.f32.mrf.mxu0 }
 0xa83   :  { %v570_v40 = vadd.f32 %v569_v39, %v1415_v38 }
 0xa85   :  { %1041 = vtanh.f32 %v570_v40  ;;  %v973_v46 = vmul.f32 -1.442695, %v570_v40 }
 0xa87   :  { %1043 = vpow2.f32 %v973_v46 }
 0xa8b   :  { %v1042_v45 = vpop.eup %1041 }
 0xa8c   :  { %594 = vrot.lane.b32.xlu0 %v1042_v45, %s1260_s6 }
 0xa8d   :  { %v1044_v47 = vpop.eup %1043 }
 0xa8e   :  { %v575_v37 = vadd.f32 1.0, %v1044_v47 }
 0xa90   :  { %1045 = vrcp.f32 %v575_v37  ;;  %v587_v53 = vand.u32 2147483648, %v575_v37  ;;  %vm581_vm6 = vweird.f32 %v575_v37  ;;  %v585_v54 = vand.u32 2147483647, %v575_v37 }
 0xa92   :  { %v588_v55 = vor.u32 1.1754944e-38, %v587_v53  ;;  %vm586_vm8 = vcmp.eq.f32.partialorder %v585_v54, 8.507059e+37 }
 0xa96   :  { %v1046_v48 = vpop.eup %1045 }
 0xa97   :  { %v577_v49 = vmul.f32 %v1046_v48, %v575_v37  ;;  %vm582_vm5 = vweird.f32 %v1046_v48 }
 0xa98   :  { %vm583_vm7 = vmor %vm581_vm6, %vm582_vm5 }
 0xa99   :  { %v578_v50 = vsub.f32 1.0, %v577_v49 }
 0xa9b   :  { %v579_v51 = vmul.f32 %v1046_v48, %v578_v50 }
 0xa9d   :  { %v580_v52 = vadd.f32 %v1046_v48, %v579_v51 }
 0xa9f   :  { %v584_v38 = vsel %vm583_vm7, %v1046_v48, %v580_v52 }
 0xaa0   :  { %v589_v58 = vsel %vm586_vm8, %v588_v55, %v584_v38  ;;  %vm858_vm8 = vcmask 1045504  }
 0xaa1   :  { %v592_v0 = vmul.f32 %v589_v58, %v536_v22 }
 0xafe   :  { %v595_v56 = vpop.permute.xlu0 %594 }
 0xaff   :  { %v597_v61 = vmul.f32 %v595_v56, %v589_v58 }
 0xb01   :  { %599 = vrot.lane.b32.xlu2 %v597_v61, %s1261_s30 }
 0xb5b   :  { %v600_v3 = vpop.permute.xlu2 %599 }
 0xb5c   :  { %v602_v4 = vadd.f32 %v600_v3, %v592_v0 }
 0xb5e   :  { %1047 = vtanh.f32 %v602_v4 }
 0xb64   :  { %v1048_v5 = vpop.eup %1047 }
 0xb65   :  { %605 = vrot.lane.b32.xlu1 %v1048_v5, %s1262_s9 }
 0xbd7   :  { %v606_v6 = vpop.permute.xlu1 %605 }
 0xbd8   :  { %v1503_v7 = vmul.f32 %v606_v6, %v589_v58 }
 0xbda   :  { %v812_v8 = vrot.slane %v1503_v7, 1  ;;  %v829_v9 = vperm.slane %v1503_v7, 0  ;;  %610 = vrot.lane.b32.xlu0 %v1503_v7, %s1263_s10 }
 0xbdc   :  { %v1509_v10 = vperm.slane %v812_v8, 0  ;;  %v854_v11 = vsel %vm853_vm9, %v851_v34, %v829_v9 }
 0xbde   :  { %v855_v25 = vsel %vm853_vm9, %v852_v35, %v1509_v10 }
 0xc4c   :  { %v611_v12 = vpop.permute.xlu0 %610 }
 0xc4d   :  { %975 = vmatmul.msk.f32.vlgmr.msrb.gmra.mxu1 %vm275_vm15, %v611_v12 }
 0xcca   :  { %v635_v26 = vpop.f32.mrf.mxu1 }
 0xccb   :  { %v636_v28 = vadd.f32 %v635_v26, %v1421_v42 }
 0xccd   :  { %1049 = vtanh.f32 %v636_v28  ;;  %v976_v13 = vmul.f32 -1.442695, %v636_v28 }
 0xccf   :  { %1051 = vpow2.f32 %v976_v13 }
 0xcd3   :  { %v1050_v31 = vpop.eup %1049 }
 0xcd4   :  { %660 = vrot.lane.b32.xlu2 %v1050_v31, %s1260_s6 }
 0xcd5   :  { %v1052_v14 = vpop.eup %1051 }
 0xcd6   :  { %v641_v15 = vadd.f32 1.0, %v1052_v14 }
 0xcd8   :  { %1053 = vrcp.f32 %v641_v15  ;;  %v653_v20 = vand.u32 2147483648, %v641_v15  ;;  %vm647_vm12 = vweird.f32 %v641_v15  ;;  %v651_v21 = vand.u32 2147483647, %v641_v15 }
 0xcda   :  { %v654_v22 = vor.u32 1.1754944e-38, %v653_v20  ;;  %vm652_vm14 = vcmp.eq.f32.partialorder %v651_v21, 8.507059e+37 }
 0xcde   :  { %v1054_v41 = vpop.eup %1053 }
 0xcdf   :  { %v643_v16 = vmul.f32 %v1054_v41, %v641_v15  ;;  %vm648_vm10 = vweird.f32 %v1054_v41 }
 0xce0   :  { %vm649_vm13 = vmor %vm647_vm12, %vm648_vm10 }
 0xce1   :  { %v644_v17 = vsub.f32 1.0, %v643_v16 }
 0xce3   :  { %v645_v18 = vmul.f32 %v1054_v41, %v644_v17 }
 0xce5   :  { %v646_v19 = vadd.f32 %v1054_v41, %v645_v18 }
 0xce7   :  { %v650_v42 = vsel %vm649_vm13, %v1054_v41, %v646_v19 }
 0xce8   :  { %v655_v27 = vsel %vm652_vm14, %v654_v22, %v650_v42 }
 0xce9   :  { %v658_v34 = vmul.f32 %v655_v27, %v602_v4 }
 0xd2e   :  { %v661_v24 = vpop.permute.xlu2 %660 }
 0xd2f   :  { %v663_v30 = vmul.f32 %v661_v24, %v655_v27 }
 0xd31   :  { %665 = vrot.lane.b32.xlu1 %v663_v30, %s1261_s30 }
 0xda3   :  { %v666_v35 = vpop.permute.xlu1 %665 }
 0xda4   :  { %v668_v36 = vadd.f32 %v666_v35, %v658_v34 }
 0xda6   :  { %1055 = vtanh.f32 %v668_v36 }
 0xdac   :  { %v1056_v39 = vpop.eup %1055 }
 0xdad   :  { %671 = vrot.lane.b32.xlu0 %v1056_v39, %s1262_s9 }
 0xe1f   :  { %v672_v40 = vpop.permute.xlu0 %671 }
 0xe20   :  { %v1521_v45 = vmul.f32 %v672_v40, %v655_v27 }
 0xe22   :  { %v813_v46 = vrot.slane %v1521_v45, 1  ;;  %v833_v47 = vperm.slane %v1521_v45, 0  ;;  %676 = vrot.lane.b32.xlu2 %v1521_v45, %s1263_s10 }
 0xe24   :  { %v1527_v37 = vperm.slane %v813_v46, 0  ;;  %v856_v48 = vsel %vm184_vm2, %v854_v11, %v833_v47 }
 0xe26   :  { %v857_v49 = vsel %vm184_vm2, %v855_v25, %v1527_v37 }
 0xe7c   :  { %v677_v50 = vpop.permute.xlu2 %676 }
 0xe7d   :  { %978 = vmatmul.msk.f32.vlgmr.msra.gmra.mxu2 %vm275_vm15, %v677_v50 }
 0xf00   :  { %v701_v51 = vpop.f32.mrf.mxu2 }
 0xf01   :  { %v702_v52 = vadd.f32 %v701_v51, %v1424_v43 }
 0xf03   :  { %1057 = vtanh.f32 %v702_v52  ;;  %v979_v54 = vmul.f32 -1.442695, %v702_v52 }
 0xf05   :  { %1059 = vpow2.f32 %v979_v54 }
 0xf09   :  { %v1058_v53 = vpop.eup %1057 }
 0xf0a   :  { %726 = vrot.lane.b32.xlu1 %v1058_v53, %s1260_s6 }
 0xf0b   :  { %v1060_v38 = vpop.eup %1059 }
 0xf0c   :  { %v707_v55 = vadd.f32 1.0, %v1060_v38 }
 0xf0e   :  { %1061 = vrcp.f32 %v707_v55  ;;  %v719_v4 = vand.u32 2147483648, %v707_v55  ;;  %vm713_vm5 = vweird.f32 %v707_v55  ;;  %v717_v5 = vand.u32 2147483647, %v707_v55 }
 0xf10   :  { %v720_v6 = vor.u32 1.1754944e-38, %v719_v4  ;;  %vm718_vm7 = vcmp.eq.f32.partialorder %v717_v5, 8.507059e+37 }
 0xf14   :  { %v1062_v56 = vpop.eup %1061 }
 0xf15   :  { %v709_v58 = vmul.f32 %v1062_v56, %v707_v55  ;;  %vm714_vm1 = vweird.f32 %v1062_v56 }
 0xf16   :  { %vm715_vm6 = vmor %vm713_vm5, %vm714_vm1  ;;  %vm861_vm1 = vcmask 1046528  }
 0xf17   :  { %v710_v61 = vsub.f32 1.0, %v709_v58 }
 0xf19   :  { %v711_v0 = vmul.f32 %v1062_v56, %v710_v61 }
 0xf1b   :  { %v712_v3 = vadd.f32 %v1062_v56, %v711_v0 }
 0xf1d   :  { %v716_v43 = vsel %vm715_vm6, %v1062_v56, %v712_v3 }
 0xf1e   :  { %v721_v11 = vsel %vm718_vm7, %v720_v6, %v716_v43 }
 0xf1f   :  { %v724_v12 = vmul.f32 %v721_v11, %v668_v36 }
 0xf7c   :  { %v727_v8 = vpop.permute.xlu1 %726 }
 0xf7d   :  { %v729_v25 = vmul.f32 %v727_v8, %v721_v11 }
 0xf7f   :  { %731 = vrot.lane.b32.xlu0 %v729_v25, %s1261_s30 }
 0xff1   :  { %v732_v26 = vpop.permute.xlu0 %731 }
 0xff2   :  { %v734_v28 = vadd.f32 %v732_v26, %v724_v12 }
 0xff4   :  { %1063 = vtanh.f32 %v734_v28 }
 0xffa   :  { %v1064_v31 = vpop.eup %1063 }
 0xffb   :  { %737 = vrot.lane.b32.xlu2 %v1064_v31, %s1262_s9 }
0x1055   :  { %v738_v13 = vpop.permute.xlu2 %737 }
0x1056   :  { %v740_v14 = vmul.f32 %v738_v13, %v721_v11  ;;  %v865_v11 = vperm.slane %v1432_v2, 0 }
0x1058   :  { %v814_v15 = vrot.slane %v740_v14, 1  ;;  %v837_v41 = vperm.slane %v740_v14, 0  ;;  %742 = vrot.lane.b32.xlu1 %v740_v14, %s1263_s10 }
0x105a   :  { %v838_v16 = vperm.slane %v814_v15, 0  ;;  %v859_v17 = vsel %vm858_vm8, %v856_v48, %v837_v41 }
0x105c   :  { %v860_v18 = vsel %vm858_vm8, %v857_v49, %v838_v16 }
0x10ca   :  { %v743_v19 = vpop.permute.xlu1 %742 }
0x10cb   :  { %981 = vmatmul.msk.f32.vlgmr.msra.gmra.mxu3 %vm275_vm15, %v743_v19 }
0x114e   :  { %v767_v20 = vpop.f32.mrf.mxu3 }
0x114f   :  { %v768_v21 = vadd.f32 %v767_v20, %v1427_v44 }
0x1151   :  { %1065 = vtanh.f32 %v768_v21  ;;  %v982_v22 = vmul.f32 -1.442695, %v768_v21 }
0x1153   :  { %1067 = vpow2.f32 %v982_v22 }
0x1157   :  { %v1066_v42 = vpop.eup %1065 }
0x1158   :  { %792 = vrot.lane.b32.xlu0 %v1066_v42, %s1260_s6 }
0x1159   :  { %v1068_v24 = vpop.eup %1067 }
0x115a   :  { %v773_v27 = vadd.f32 1.0, %v1068_v24 }
0x115c   :  { %1069 = vrcp.f32 %v773_v27  ;;  %v785_v40 = vand.u32 2147483648, %v773_v27  ;;  %vm779_vm12 = vweird.f32 %v773_v27  ;;  %v783_v46 = vand.u32 2147483647, %v773_v27 }
0x115e   :  { %v786_v48 = vor.u32 1.1754944e-38, %v785_v40  ;;  %vm784_vm14 = vcmp.eq.f32.partialorder %v783_v46, 8.507059e+37 }
0x1162   :  { %v1070_v30 = vpop.eup %1069 }
0x1163   :  { %v775_v34 = vmul.f32 %v1070_v30, %v773_v27  ;;  %vm780_vm10 = vweird.f32 %v1070_v30 }
0x1164   :  { %vm781_vm13 = vmor %vm779_vm12, %vm780_vm10 }
0x1165   :  { %v776_v35 = vsub.f32 1.0, %v775_v34 }
0x1167   :  { %v777_v36 = vmul.f32 %v1070_v30, %v776_v35 }
0x1169   :  { %v778_v39 = vadd.f32 %v1070_v30, %v777_v36 }
0x116b   :  { %v782_v44 = vsel %vm781_vm13, %v1070_v30, %v778_v39 }
0x116c   :  { %v787_v50 = vsel %vm784_vm14, %v786_v48, %v782_v44 }
0x116d   :  { %v790_v52 = vmul.f32 %v787_v50, %v734_v28 }
0x11ca   :  { %v793_v49 = vpop.permute.xlu0 %792 }
0x11cb   :  { %v795_v51 = vmul.f32 %v793_v49, %v787_v50 }
0x11cd   :  { %797 = vrot.lane.b32.xlu2 %v795_v51, %s1261_s30 }
0x1227   :  { %v798_v53 = vpop.permute.xlu2 %797 }
0x1228   :  { %v800_v54 = vadd.f32 %v798_v53, %v790_v52 }
0x122a   :  { %1071 = vtanh.f32 %v800_v54  ;;  %904 = vrot.lane.b32.xlu0 %v800_v54, %s1262_s9 }
0x1230   :  { %v1072_v38 = vpop.eup %1071 }
0x1231   :  { %803 = vrot.lane.b32.xlu1 %v1072_v38, %s1262_s9 }
0x12a3   :  { %v804_v55 = vpop.permute.xlu1 %803 }
0x12a4   :  { %v806_v56 = vmul.f32 %v804_v55, %v787_v50 }
0x12a6   :  { %v869_v58 = vsel %vm845_vm11, %v806_v56, %v837_v41  ;;  %v841_v61 = vperm.slane %v806_v56, 0  ;;  %v816_v0 = vrot.slane %v806_v56, 1 }
0x12a7   :  { %v871_v3 = vsel %vm279_vm3, %v869_v58, %v833_v47 }
0x12a8   :  { %v862_v4 = vsel %vm861_vm1, %v859_v17, %v841_v61  ;;  %v842_v5 = vperm.slane %v816_v0, 0  ;;  %v870_v43 = vsel %vm845_vm11, %v816_v0, %v838_v16  ;;  %v873_v6 = vsel %vm850_vm4, %v871_v3, %v829_v9 }
0x12a9   :  { %885 = vrot.lane.b32.xlu2 %v862_v4, %s1263_s10  ;;  %v875_v8 = vsel %vm853_vm9, %v873_v6, %v825_v32  ;;  %v872_v45 = vsel %vm279_vm3, %v870_v43, %v1527_v37 }
0x12aa   :  { %v863_v47 = vsel %vm861_vm1, %v860_v18, %v842_v5  ;;  %v877_v25 = vsel %vm184_vm2, %v875_v8, %v821_v62  ;;  %v874_v7 = vsel %vm850_vm4, %v872_v45, %v1509_v10  ;;  %v866_v62 = vperm.slane %v807_v63, 0 }
0x12ab   :  { %887 = vrot.lane.b32.xlu1 %v863_v47, %s1263_s10  ;;  %v879_v29 = vsel %vm858_vm8, %v877_v25, %v817_v57  ;;  %v876_v32 = vsel %vm853_vm9, %v874_v7, %v1491_v33  ;;  %v905_v57 = vpop.permute.xlu0 %904 }
0x12ac   :  { %v881_v9 = vsel %vm861_vm1, %v879_v29, %v865_v11  ;;  %v878_v37 = vsel %vm184_vm2, %v876_v32, %v1469_v1  ;;  %vm912_vm2 = vcmask 205824  }
0x12ad   :  { %893 = vrot.lane.b32.xlu0 %v881_v9, %s1263_s10  ;;  %v880_v59 = vsel %vm858_vm8, %v878_v37, %v1458_v60 }
0x12ae   :  { %v882_v23 = vsel %vm861_vm1, %v880_v59, %v866_v62 }
0x12b1   :  { %895 = vrot.lane.b32.xlu2 %v882_v23, %s1263_s10 }
0x12b3   :  { %906 = vrot.lane.b32.xlu1 %v806_v56, %s1263_s10 }
0x12b5   :  { %908 = vrot.lane.b32.xlu0 %v905_v57, %s1263_s10 }
0x1303   :  { %v886_v33 = vpop.permute.xlu2 %885 }
0x130b   :  { %v896_v60 = vpop.permute.xlu2 %895 }
0x131d   :  { %v888_v1 = vpop.permute.xlu1 %887 }
0x131e   :  { %v900_v2 = vsel %vm108_vm0, %v888_v1, %v896_v60 }
0x131f   :  { %902 = vst.msk [vmem:[#allocation11 + $0x8] sm:$0xff] %vm275_vm15, %v900_v2  ;;  %v894_v63 = vpop.permute.xlu0 %893 }
0x1320   :  { %v899_v10 = vsel %vm108_vm0, %v886_v33, %v894_v63 }
0x1321   :  { %901 = vst.msk [vmem:[#allocation11] sm:$0xff] %vm275_vm15, %v899_v10 }
0x1322   :  { %927 = dma.vmem_to_hbm [thread:$0]  %s920_s12, 256, %s922_s15, [#allocation4], %s1253_s1, %s1253_s1, %s1254_s18  }
0x1325   :  { %v907_v12 = vpop.permute.xlu1 %906 }
0x1326   :  { %913 = vst.msk [vmem:[#allocation12] sm:$0x3] %vm912_vm2, %v907_v12 }
0x1327   :  { %v909_v26 = vpop.permute.xlu0 %908 }
0x1328   :  { %914 = vst.msk [vmem:[#allocation12 + $0x2] sm:$0x3] %vm912_vm2, %v909_v26 }
0x1329   :  { %940 = dma.vmem_to_hbm [thread:$0]  %s933_s17, 64, %s935_s21, [#allocation13], %s1266_s7, %s1266_s7, %s1267_s4  }
0x132a   :  { %1247 = dma.done.wait [#allocation4], 256  }
0x132b   :  { %1248 = vsyncadd [#allocation4], 4294967040 }
0x132c   :  { %1249 = dma.done.wait [#allocation13], 64  }
0x132d   :  { %1250 = vsyncadd [#allocation13], 4294967232 }
0x132e   :  { %949 = vsyncpa [#allocation3], 1 }
0x132f   :  { %950 = vsyncpa [#allocation6], 1 }
0x1330   :  { %951 = vsyncpa [#allocation9], 1 }
0x1331   :  { %952 = vsyncpa [#allocation4], 1 }
0x1332   :  { %953 = vsyncpa [#allocation13], 1 }

</bundles_post_ra>
